<compile_context>
chip_gen: v7x
topology: tpu7x:2x2x1
jax: 0.10.0
libtpu: 0.0.40
codegen_flags: <defaults>
</compile_context>

<pallas_src>
import functools

import jax
import jax.numpy as jnp
from jax import lax
from jax.experimental import pallas as pl
from jax.experimental.pallas import tpu as pltpu


def _shift_with_zeros(x, off):
    """out[:, p] = x[:, p + off] if 0 <= p + off < HW else 0 (static lane shift)."""
    if off == 0:
        return x
    c, hw = x.shape
    zeros = jnp.zeros((c, abs(off)), dtype=x.dtype)
    if off > 0:
        return jnp.concatenate([x[:, off:], zeros], axis=1)
    return jnp.concatenate([zeros, x[:, : hw + off]], axis=1)


def residual_block_kernel(x_ref, w1_ref, b1_ref, w2_ref, b2_ref, o_ref, *, H, W):
    # x_ref : (B_blk, Cin, H*W)   NCHW input, spatial flattened into lanes
    # w1_ref: (Cout, 9*Cin)       3x3 conv weights, im2col-packed (tap-major)
    # b1_ref: (Cout, 1)           3x3 conv bias (broadcast over lanes)
    # w2_ref: (Cin, Cout)         1x1 conv weights
    # b2_ref: (Cin, 1)            1x1 conv bias
    # o_ref : (B_blk, Cin, H*W)   output
    b_blk, cin, hw = x_ref.shape

    # Hoisted weight / bias loads (shared across the batch block).
    w1m = w1_ref[...]
    w2m = w2_ref[...]
    b1 = b1_ref[...]
    b2 = b2_ref[...]

    # Column masks for dx = +/-1 taps.  The dy (row) halo is handled for free by
    # the zero fill of the flat lane shift; only same-row wrap needs masking.
    lane = lax.broadcasted_iota(jnp.int32, (cin, hw), 1)
    if W & (W - 1) == 0:                 # power-of-two W -> cheap bitwise AND
        col = jnp.bitwise_and(lane, W - 1)
    else:
        col = lax.rem(lane, W)
    col_mask = {
        -1: col != 0,                    # reading x at column x-1
        0: None,
        1: col != (W - 1),               # reading x at column x+1
    }

    for b in range(b_blk):
        x = x_ref[b]                                       # (Cin, H*W), f32

        # ---- build im2col tile: 9 shifted taps stacked along the K dim ----
        taps = []
        for ky in range(3):
            for kx in range(3):
                dy, dx = ky - 1, kx - 1
                t = _shift_with_zeros(x, dy * W + dx)
                m = col_mask[dx]
                if m is not None:
                    t = jnp.where(m, t, 0.0)
                taps.append(t)
        xcol = jnp.concatenate(taps, axis=0)               # (9*Cin, H*W)

        # ---- conv3x3 (+bias, ReLU): one lane-dense MXU matmul ----
        # (kept in f32 for exact parity with the PyTorch module; cast xcol/w1m
        #  to bf16 here for extra MXU throughput on v6e/v7x if tolerable)
        h = jnp.dot(w1m, xcol, preferred_element_type=jnp.float32)   # (Cout, HW)
        h = jnp.maximum(h + b1, 0.0)

        # ---- conv1x1 back to Cin channels + residual + final ReLU ----
        y = jnp.dot(w2m, h, preferred_element_type=jnp.float32) + b2  # (Cin, HW)
        y = jnp.maximum(y + x, 0.0)

        o_ref[b] = y.astype(o_ref.dtype)


def _choose_batch_block(N, Cin, Cout, H, W, vmem_budget_bytes=8 * 1024 * 1024):
    """Pick how many images to process per grid step.

    Big enough to amortize the ~0.35us per-step overhead, small enough to stay
    well inside VMEM (sized for v7x's smaller VMEM), and keeping >= 2 grid
    steps when N >= 2 so both v7x TensorCores get work.
    """
    per_img = 4 * H * W * (2 * Cin + 2 * Cin + 9 * Cin + Cout + Cin)
    cap = max(1, vmem_budget_bytes // max(per_img, 1))
    if N >= 2:
        cap = min(cap, N // 2)
    cap = max(1, cap)
    best = 1
    for d in range(1, min(cap, N) + 1):
        if N % d == 0:
            best = d
    return best


def residual_block(x, w1, b1, w2, b2, *, batch_block=None):
    """ResidualBlock forward.

    x : (N, Cin, H, W) float32, NCHW (kept NCHW — no transpose / pad passes)
    w1: (Cout, Cin, 3, 3), b1: (Cout,)   -- Conv2d(Cin, Cout, 3, padding=1)
    w2: (Cin, Cout, 1, 1), b2: (Cin,)    -- Conv2d(Cout, Cin, 1)
    returns (N, Cin, H, W)
    """
    N, Cin, H, W = x.shape
    Cout = w1.shape[0]
    HW = H * W

    # Weight repacking (tiny, weights-only):
    # w1m[o, (ky*3+kx)*Cin + c] = w1[o, c, ky, kx]
    w1m = jnp.transpose(w1, (0, 2, 3, 1)).reshape(Cout, 9 * Cin)
    w2m = w2.reshape(Cin, Cout)
    b1c = b1.reshape(Cout, 1)
    b2c = b2.reshape(Cin, 1)

    # Free row-major reshape: spatial dims merged into one lane-dense axis.
    x_flat = x.reshape(N, Cin, HW)

    if batch_block is None:
        batch_block = _choose_batch_block(N, Cin, Cout, H, W)
    grid = (N // batch_block,)

    kernel = functools.partial(residual_block_kernel, H=H, W=W)

    out_flat = pl.pallas_call(
        kernel,
        out_shape=jax.ShapeDtypeStruct((N, Cin, HW), x.dtype),
        grid_spec=pltpu.PrefetchScalarGridSpec(
            num_scalar_prefetch=0,
            grid=grid,
            in_specs=[
                pl.BlockSpec((batch_block, Cin, HW), lambda n: (n, 0, 0)),
                pl.BlockSpec((Cout, 9 * Cin), lambda n: (0, 0)),
                pl.BlockSpec((Cout, 1), lambda n: (0, 0)),
                pl.BlockSpec((Cin, Cout), lambda n: (0, 0)),
                pl.BlockSpec((Cin, 1), lambda n: (0, 0)),
            ],
            out_specs=pl.BlockSpec((batch_block, Cin, HW), lambda n: (n, 0, 0)),
        ),
        compiler_params=pltpu.CompilerParams(
            dimension_semantics=("parallel",),
            vmem_limit_bytes=32 * 1024 * 1024,
        ),
    )(x_flat, w1m, b1c, w2m, b2c)

    return out_flat.reshape(N, Cin, H, W)


def reference_residual_block(x, w1, b1, w2, b2):
    """Plain-JAX/XLA reference (independent of the kernel's math)."""
    h = lax.conv_general_dilated(
        x, w1, window_strides=(1, 1), padding=((1, 1), (1, 1)),
        dimension_numbers=("NCHW", "OIHW", "NCHW"))
    h = jnp.maximum(h + b1[None, :, None, None], 0.0)
    y = lax.conv_general_dilated(
        h, w2, window_strides=(1, 1), padding="VALID",
        dimension_numbers=("NCHW", "OIHW", "NCHW"))
    y = y + b2[None, :, None, None]
    return jnp.maximum(y + x, 0.0)


if __name__ == "__main__":
    N, Cin, Cout, H, W = 2, 4, 8, 16, 16

    key = jax.random.PRNGKey(0)
    kx, k1, kb1, k2, kb2 = jax.random.split(key, 5)

    x = jax.random.normal(kx, (N, Cin, H, W), dtype=jnp.float32)

    # Deterministic parameter init (Kaiming-uniform-like bounds, PyTorch shapes).
    fan1 = Cin * 3 * 3
    bound1 = 1.0 / (fan1 ** 0.5)
    w1 = jax.random.uniform(k1, (Cout, Cin, 3, 3), jnp.float32, -bound1, bound1)
    b1 = jax.random.uniform(kb1, (Cout,), jnp.float32, -bound1, bound1)

    fan2 = Cout * 1 * 1
    bound2 = 1.0 / (fan2 ** 0.5)
    w2 = jax.random.uniform(k2, (Cin, Cout, 1, 1), jnp.float32, -bound2, bound2)
    b2 = jax.random.uniform(kb2, (Cin,), jnp.float32, -bound2, bound2)

    out = jax.block_until_ready(residual_block(x, w1, b1, w2, b2))
    ref = jax.block_until_ready(reference_residual_block(x, w1, b1, w2, b2))

    assert out.shape == (N, Cin, H, W)
    assert jnp.allclose(out, ref, atol=1e-5, rtol=1e-5), "mismatch vs reference"

    print("KERNEL_OK")
</pallas_src>

<mosaic_0001>
module attributes {stable_mosaic.version = 11 : i64} {
  func.func @residual_block_kernel(%arg0: i32, %arg1: memref<1x4x256xf32, #tpu.memory_space<vmem>>, %arg2: memref<8x36xf32, #tpu.memory_space<vmem>>, %arg3: memref<8x1xf32, #tpu.memory_space<vmem>>, %arg4: memref<4x8xf32, #tpu.memory_space<vmem>>, %arg5: memref<4x1xf32, #tpu.memory_space<vmem>>, %arg6: memref<1x4x256xf32, #tpu.memory_space<vmem>>) attributes {dimension_semantics = [#tpu.dimension_semantics<parallel>], iteration_bounds = array<i64: 2>, scalar_prefetch = 0 : i64, scratch_operands = 0 : i64, tpu.core_type = #tpu.core_type<tc>, window_params = [{transform_indices = @transform_0, window_bounds = array<i64: 1, 4, 256>}, {pipeline_mode = #tpu.pipeline_mode<synchronous>, transform_indices = @transform_1, window_bounds = array<i64: 8, 36>}, {pipeline_mode = #tpu.pipeline_mode<synchronous>, transform_indices = @transform_2, window_bounds = array<i64: 8, 1>}, {pipeline_mode = #tpu.pipeline_mode<synchronous>, transform_indices = @transform_3, window_bounds = array<i64: 4, 8>}, {pipeline_mode = #tpu.pipeline_mode<synchronous>, transform_indices = @transform_4, window_bounds = array<i64: 4, 1>}, {transform_indices = @transform_5, window_bounds = array<i64: 1, 4, 256>}]} {
    %c0 = arith.constant 0 : index
    %c0_0 = arith.constant 0 : index
    %0 = vector.load %arg2[%c0, %c0_0] : memref<8x36xf32, #tpu.memory_space<vmem>>, vector<8x36xf32>
    %c0_1 = arith.constant 0 : index
    %c0_2 = arith.constant 0 : index
    %1 = vector.load %arg4[%c0_1, %c0_2] : memref<4x8xf32, #tpu.memory_space<vmem>>, vector<4x8xf32>
    %c0_3 = arith.constant 0 : index
    %c0_4 = arith.constant 0 : index
    %2 = vector.load %arg3[%c0_3, %c0_4] : memref<8x1xf32, #tpu.memory_space<vmem>>, vector<8x1xf32>
    %c0_5 = arith.constant 0 : index
    %c0_6 = arith.constant 0 : index
    %3 = vector.load %arg5[%c0_5, %c0_6] : memref<4x1xf32, #tpu.memory_space<vmem>>, vector<4x1xf32>
    %4 = tpu.iota {dimensions = array<i32: 1>} : vector<4x256xi32>
    %c15_i32 = arith.constant 15 : i32
    %5 = vector.broadcast %c15_i32 : i32 to vector<4x256xi32>
    %6 = arith.andi %4, %5 : vector<4x256xi32>
    %c0_i32 = arith.constant 0 : i32
    %7 = vector.broadcast %c0_i32 : i32 to vector<4x256xi32>
    %8 = arith.cmpi ne, %6, %7 : vector<4x256xi32>
    %c15_i32_7 = arith.constant 15 : i32
    %9 = vector.broadcast %c15_i32_7 : i32 to vector<4x256xi32>
    %10 = arith.cmpi ne, %6, %9 : vector<4x256xi32>
    %c0_8 = arith.constant 0 : index
    %c0_9 = arith.constant 0 : index
    %c0_10 = arith.constant 0 : index
    %11 = vector.load %arg1[%c0_8, %c0_9, %c0_10] : memref<1x4x256xf32, #tpu.memory_space<vmem>>, vector<1x4x256xf32>
    %12 = vector.shape_cast %11 : vector<1x4x256xf32> to vector<4x256xf32>
    %cst = arith.constant 0.000000e+00 : f32
    %13 = vector.broadcast %cst : f32 to vector<4x17xf32>
    %14 = vector.extract_strided_slice %12 {offsets = [0, 0], sizes = [4, 239], strides = [1, 1]} : vector<4x256xf32> to vector<4x239xf32>
    %15 = tpu.concatenate %13, %14 in 1 : vector<4x17xf32>, vector<4x239xf32> -> vector<4x256xf32>
    %cst_11 = arith.constant 0.000000e+00 : f32
    %16 = vector.broadcast %cst_11 : f32 to vector<4x256xf32>
    %17 = arith.select %8, %15, %16 : vector<4x256xi1>, vector<4x256xf32>
    %cst_12 = arith.constant 0.000000e+00 : f32
    %18 = vector.broadcast %cst_12 : f32 to vector<4x16xf32>
    %19 = vector.extract_strided_slice %12 {offsets = [0, 0], sizes = [4, 240], strides = [1, 1]} : vector<4x256xf32> to vector<4x240xf32>
    %20 = tpu.concatenate %18, %19 in 1 : vector<4x16xf32>, vector<4x240xf32> -> vector<4x256xf32>
    %cst_13 = arith.constant 0.000000e+00 : f32
    %21 = vector.broadcast %cst_13 : f32 to vector<4x15xf32>
    %22 = vector.extract_strided_slice %12 {offsets = [0, 0], sizes = [4, 241], strides = [1, 1]} : vector<4x256xf32> to vector<4x241xf32>
    %23 = tpu.concatenate %21, %22 in 1 : vector<4x15xf32>, vector<4x241xf32> -> vector<4x256xf32>
    %cst_14 = arith.constant 0.000000e+00 : f32
    %24 = vector.broadcast %cst_14 : f32 to vector<4x256xf32>
    %25 = arith.select %10, %23, %24 : vector<4x256xi1>, vector<4x256xf32>
    %cst_15 = arith.constant 0.000000e+00 : f32
    %26 = vector.broadcast %cst_15 : f32 to vector<4x1xf32>
    %27 = vector.extract_strided_slice %12 {offsets = [0, 0], sizes = [4, 255], strides = [1, 1]} : vector<4x256xf32> to vector<4x255xf32>
    %28 = tpu.concatenate %26, %27 in 1 : vector<4x1xf32>, vector<4x255xf32> -> vector<4x256xf32>
    %cst_16 = arith.constant 0.000000e+00 : f32
    %29 = vector.broadcast %cst_16 : f32 to vector<4x256xf32>
    %30 = arith.select %8, %28, %29 : vector<4x256xi1>, vector<4x256xf32>
    %cst_17 = arith.constant 0.000000e+00 : f32
    %31 = vector.broadcast %cst_17 : f32 to vector<4x1xf32>
    %32 = vector.extract_strided_slice %12 {offsets = [0, 1], sizes = [4, 255], strides = [1, 1]} : vector<4x256xf32> to vector<4x255xf32>
    %33 = tpu.concatenate %32, %31 in 1 : vector<4x255xf32>, vector<4x1xf32> -> vector<4x256xf32>
    %cst_18 = arith.constant 0.000000e+00 : f32
    %34 = vector.broadcast %cst_18 : f32 to vector<4x256xf32>
    %35 = arith.select %10, %33, %34 : vector<4x256xi1>, vector<4x256xf32>
    %cst_19 = arith.constant 0.000000e+00 : f32
    %36 = vector.broadcast %cst_19 : f32 to vector<4x15xf32>
    %37 = vector.extract_strided_slice %12 {offsets = [0, 15], sizes = [4, 241], strides = [1, 1]} : vector<4x256xf32> to vector<4x241xf32>
    %38 = tpu.concatenate %37, %36 in 1 : vector<4x241xf32>, vector<4x15xf32> -> vector<4x256xf32>
    %cst_20 = arith.constant 0.000000e+00 : f32
    %39 = vector.broadcast %cst_20 : f32 to vector<4x256xf32>
    %40 = arith.select %8, %38, %39 : vector<4x256xi1>, vector<4x256xf32>
    %cst_21 = arith.constant 0.000000e+00 : f32
    %41 = vector.broadcast %cst_21 : f32 to vector<4x16xf32>
    %42 = vector.extract_strided_slice %12 {offsets = [0, 16], sizes = [4, 240], strides = [1, 1]} : vector<4x256xf32> to vector<4x240xf32>
    %43 = tpu.concatenate %42, %41 in 1 : vector<4x240xf32>, vector<4x16xf32> -> vector<4x256xf32>
    %cst_22 = arith.constant 0.000000e+00 : f32
    %44 = vector.broadcast %cst_22 : f32 to vector<4x17xf32>
    %45 = vector.extract_strided_slice %12 {offsets = [0, 17], sizes = [4, 239], strides = [1, 1]} : vector<4x256xf32> to vector<4x239xf32>
    %46 = tpu.concatenate %45, %44 in 1 : vector<4x239xf32>, vector<4x17xf32> -> vector<4x256xf32>
    %cst_23 = arith.constant 0.000000e+00 : f32
    %47 = vector.broadcast %cst_23 : f32 to vector<4x256xf32>
    %48 = arith.select %10, %46, %47 : vector<4x256xi1>, vector<4x256xf32>
    %49 = tpu.concatenate %17, %20, %25, %30, %12, %35, %40, %43, %48 in 0 : vector<4x256xf32>, vector<4x256xf32>, vector<4x256xf32>, vector<4x256xf32>, vector<4x256xf32>, vector<4x256xf32>, vector<4x256xf32>, vector<4x256xf32>, vector<4x256xf32> -> vector<36x256xf32>
    %cst_24 = arith.constant dense<0.000000e+00> : vector<8x256xf32>
    %50 = tpu.matmul %0, %49, %cst_24 {dimension_numbers = #tpu.dot_dimension_numbers<[1], [0], [0], [1], [0, 0, 1, 1], [], []>} : vector<8x36xf32>, vector<36x256xf32>, vector<8x256xf32> -> vector<8x256xf32>
    %51 = vector.broadcast %2 : vector<8x1xf32> to vector<8x256xf32>
    %52 = arith.addf %50, %51 : vector<8x256xf32>
    %cst_25 = arith.constant 0.000000e+00 : f32
    %53 = vector.broadcast %cst_25 : f32 to vector<8x256xf32>
    %54 = arith.maximumf %52, %53 : vector<8x256xf32>
    %cst_26 = arith.constant dense<0.000000e+00> : vector<4x256xf32>
    %55 = tpu.matmul %1, %54, %cst_26 {dimension_numbers = #tpu.dot_dimension_numbers<[1], [0], [0], [1], [0, 0, 1, 1], [], []>} : vector<4x8xf32>, vector<8x256xf32>, vector<4x256xf32> -> vector<4x256xf32>
    %56 = vector.broadcast %3 : vector<4x1xf32> to vector<4x256xf32>
    %57 = arith.addf %55, %56 : vector<4x256xf32>
    %58 = arith.addf %57, %12 : vector<4x256xf32>
    %cst_27 = arith.constant 0.000000e+00 : f32
    %59 = vector.broadcast %cst_27 : f32 to vector<4x256xf32>
    %60 = arith.maximumf %58, %59 : vector<4x256xf32>
    %c0_28 = arith.constant 0 : index
    %c0_29 = arith.constant 0 : index
    %c0_30 = arith.constant 0 : index
    %61 = vector.load %arg6[%c0_28, %c0_29, %c0_30] : memref<1x4x256xf32, #tpu.memory_space<vmem>>, vector<1x4x256xf32>
    %62 = vector.shape_cast %61 : vector<1x4x256xf32> to vector<4x256xf32>
    %63 = vector.shape_cast %60 : vector<4x256xf32> to vector<1x4x256xf32>
    tpu.vector_store %arg6[%c0_28, %c0_29, %c0_30], %63 {strides = array<i32>} : memref<1x4x256xf32, #tpu.memory_space<vmem>>, vector<1x4x256xf32>,
    return
  }
  func.func @transform_0(%arg0: i32) -> (i32, i32, i32) {
    %c0_i32 = arith.constant 0 : i32
    %c0_i32_0 = arith.constant 0 : i32
    %c0_i32_1 = arith.constant 0 : i32
    return %arg0, %c0_i32, %c0_i32_0 : i32, i32, i32
  }
  func.func @transform_1(%arg0: i32) -> (i32, i32) {
    %c0_i32 = arith.constant 0 : i32
    %c0_i32_0 = arith.constant 0 : i32
    %c0_i32_1 = arith.constant 0 : i32
    return %c0_i32, %c0_i32_0 : i32, i32
  }
  func.func @transform_2(%arg0: i32) -> (i32, i32) {
    %c0_i32 = arith.constant 0 : i32
    %c0_i32_0 = arith.constant 0 : i32
    %c0_i32_1 = arith.constant 0 : i32
    return %c0_i32, %c0_i32_0 : i32, i32
  }
  func.func @transform_3(%arg0: i32) -> (i32, i32) {
    %c0_i32 = arith.constant 0 : i32
    %c0_i32_0 = arith.constant 0 : i32
    %c0_i32_1 = arith.constant 0 : i32
    return %c0_i32, %c0_i32_0 : i32, i32
  }
  func.func @transform_4(%arg0: i32) -> (i32, i32) {
    %c0_i32 = arith.constant 0 : i32
    %c0_i32_0 = arith.constant 0 : i32
    %c0_i32_1 = arith.constant 0 : i32
    return %c0_i32, %c0_i32_0 : i32, i32
  }
  func.func @transform_5(%arg0: i32) -> (i32, i32, i32) {
    %c0_i32 = arith.constant 0 : i32
    %c0_i32_0 = arith.constant 0 : i32
    %c0_i32_1 = arith.constant 0 : i32
    return %arg0, %c0_i32, %c0_i32_0 : i32, i32, i32
  }
}

</mosaic_0001>

<bundles_post_ra>
// kernel: tpu_custom_call.1
= control target key start
LH: loop header
LB: loop body
LE: loop exit
PB: predicated region body
PF: predicated region fallthrough
CT: control target
= control target key end

     0   :  { %10 = vsyncpa [#allocation3], 0  ;;  %s1152_s0 = inlined_call_operand.hbm [shape: f32[2,4,256], index: 0, kind: input, shape index: {}]   ;;  %s1153_s1 = inlined_call_operand.vmem [shape: f32[8,36], index: 1, kind: input, shape index: {}]   ;;  %s1154_s2 = inlined_call_operand.vmem [shape: f32[8,1], index: 2, kind: input, shape index: {}]   ;;  %s1155_s3 = inlined_call_operand.vmem [shape: f32[4,8], index: 3, kind: input, shape index: {}]   ;;  %s1156_s4 = inlined_call_operand.vmem [shape: f32[4,1], index: 4, kind: input, shape index: {}]   ;;  %s1157_s5 = inlined_call_operand.hbm [shape: f32[2,4,256], index: 5, kind: output, shape index: {}]  }
   0x1   :  { %12 = vsyncpa [#allocation3 + $0x1], 0 }
   0x2   :  { %13 = vsyncpa [#allocation4], 0 }
   0x3   :  { %15 = vsyncpa [#allocation4 + $0x1], 0  ;;  %s895_s18 = smov 0   ;;  %s897_s19 = smov 0  }
   0x4   :  { %s899_s20 = smov 0   ;;  %s901_s21 = smov 0  }
   0x5 LB: > { %s916_s22 = sadd.s32 4294967295, %s851_s21   ;;  %s633_s23 = sadd.s32 4294967294, %s851_s21   ;;  %s851_s21 = sphi %s901_s21, %s1180_s21   ;;  %s847_s20 = sphi %s899_s20, %s1179_s20   ;;  %s843_s19 = sphi %s897_s19, %s1178_s19   ;;  %s839_s18 = sphi %s895_s18, %s1177_s18  }
   0x6   : > { %s920_s24 = sadd.s32 1, %s851_s21   ;;  %s28_s25 = sadd.s32 1, %s847_s20 }
   0x7   : > { %s25_s26 = ssub.s32 %s851_s21, %s920_s24  ;;  %p35_p0 = scmp.ne.s32.totalorder %s847_s20, %s843_s19 }
   0x8   : > { %p26_p1 = scmp.eq.s32.totalorder %s25_s26, 0  ;;  %p36_p2 = scmp.eq.s32.totalorder %s851_s21, 0 }
   0x9   : > { %p41_p3 = scmp.ne.s32.totalorder %s843_s19, %s839_s18  ;;  %p42_p4 = scmp.eq.s32.totalorder %s916_s22, 0 }
   0xa   : > { %s932_s27 = scalar_select %p26_p1, %s847_s20, %s28_s25  }
   0xb   : > { %p934_p5 = por %p36_p2, %p35_p0  ;;  %p938_p6 = por %p42_p4, %p41_p3 }
   0xc   : > { %p149_p7 = scmp.eq.s32.totalorder %s916_s22, 1  ;;  %p155_p8 = scmp.eq.s32.totalorder %s633_s23, 1 }
   0xd   : > { %p673_p10 = scmp.lt.s32.totalorder %s851_s21, 2  ;;  %s187_s7 = sand.u32 1, %s847_s20  }
   0xe   : > { %p945_p11 = por %p149_p7, %p35_p0  ;;  %p949_p12 = por %p155_p8, %p41_p3 }
   0xf   : > { %s651_s8 = sshll.u32 %s851_s21, 7  ;;  %s636_s9 = sshll.u32 %s187_s7, 3 }
  0x10   : > { %s1161_s30 = scalar_select %p945_p11, 1, 0 }
  0x11   : > { %s1162_s6 = scalar_select %p949_p12, 1, 0 }
  0x12   : > { %s958_s12 = scalar_lea.hbm %s1152_s0, %s651_s8  ;;  %s191_s13 = scalar_lea.vmem [#allocation2], %s636_s9 }
  0x13   : > { %s199_s14 = sshll.u32 %s191_s13, 4  ;;  %p962_p13 = pnand %p673_p10, %p934_p5  ;;  %s966_s14 = int_to_ptr.vmem [resolvable:$true] %s199_s14 }
  0x14   : > { %s188_s16 = scalar_lea.sflag [#allocation3], %s187_s7  ;;  %s755_s17 = scalar_lea.hbm %s958_s12, 128 }
  0x15   : > { %p756_p2 = scmp.ne.s32.totalorder %s958_s12, %s755_s17  ;;  %p757_p3 = pneg %p962_p13 }
  0x16   : > { %s760_s26 = scalar_lea.hbm %s1152_s0, 256  ;;  %p761_p5 = scmp.lt.u32.totalorder %s958_s12, %s1152_s0 }
  0x17   : > { %p758_p4 = pnand %p757_p3, %p756_p2  ;;  %p762_p8 = scmp.lt.u32.totalorder %s760_s26, %s755_s17 }
  0x18   : > { %p764_p9 = scmp.lt.u32.totalorder %s755_s17, %s958_s12 }
  0x19   : > { %p759_p7 = pneg %p758_p4  ;;  %p763_p10 = por %p762_p8, %p761_p5 }
  0x1b   : > { %p765_p0 = por %p764_p9, %p763_p10 }
  0x1d   : > { %p766_p1 = pnand %p765_p0, %p759_p7 }
  0x1f   : > { %769 = shalt.err (!%p766_p1)
}
  0x20   : > { %s770_s7 = scalar_lea.vmem %s966_s14, 128  ;;  %s853_s9 = smov [#allocation2]  }
  0x21   : > { %p771_p2 = scmp.ne.s32.totalorder %s966_s14, %s770_s7  ;;  %s775_s10 = sshll.u32 %s853_s9, 4  ;;  %s776_s10 = int_to_ptr.vmem [resolvable:$false] %s775_s10 }
  0x22   : > { %s777_s11 = scalar_lea.vmem %s776_s10, 256  ;;  %p778_p11 = scmp.lt.s32.totalorder %s966_s14, %s776_s10 }
  0x23   : > { %p773_p4 = pnand %p771_p2, %p757_p3  ;;  %p779_p5 = scmp.lt.s32.totalorder %s777_s11, %s770_s7 }
  0x25   : > { %p774_p12 = pneg %p773_p4  ;;  %p780_p8 = por %p779_p5, %p778_p11 }
  0x27   : > { %p781_p9 = pnand %p780_p8, %p774_p12 }
  0x29   : > { %784 = shalt.err (!%p781_p9)
}
  0x2a   : > { %668 = dma.hbm_to_vmem [thread:$0]  (!%p962_p13), %s958_s12, 128, %s966_s14, %s188_s16  }
  0x2b   : > { %p1164_p0 = scmp.lt.s32.totalorder %s851_s21, 3  ;;  %p1165_p1 = scmp.ge.s32.totalorder %s851_s21, 1 }
  0x2d   : > { %p205_p3 = pnand %p1165_p1, %p1164_p0 }
  0x2e   : > { %s1000_s13 = sand.u32 (!%p205_p3), 1, %s843_s19  }
  0x2f   : > { %208 = sbr.rel (%p205_p3) target bundleno = 654 (0x28e), region = 40  ;;  %s640_s17 = sshll.u32 (!%p205_p3), %s1000_s13, 3 }
  0x30   : > { %s211_s23 = scalar_lea.sflag (!%p205_p3), [#allocation3], %s1000_s13  ;;  %s214_s15 = scalar_lea.vmem (!%p205_p3), [#allocation2], %s640_s17 }
  0x36   : > { %830 = dma.done.wait (%p938_p6), %s211_s23, 128  }
  0x37   : > { %832 = vsyncadd (%p938_p6), %s211_s23, 4294967168  ;;  %v1010_v0 = vld [vmem:[%s214_s15] sm:$0xff]  ;;  %s854_s12 = smov 17   ;;  %s855_s14 = smov 1   ;;  %v862_v4 = vmov 0.0   ;;  %v863_v6 = vmov 0   ;;  %v245_v7 = vlaneseq }
  0x38   : > { %v1014_v1 = vcombine.high %v1010_v0, %v1010_v0  ;;  %s856_s16 = smov 15   ;;  %s857_s25 = smov 16   ;;  %450 = vmatprep.mubr.f32.mxu0 %v862_v4  ;;  %v243_v5 = vld [vmem:[%s1154_s2] sm:$0xff]  ;;  %532 = vmatprep.mubr.f32.mxu1 %v862_v4  ;;  %vm261_vm0 = vcmask 138240   ;;  %vm291_vm2 = vcmask 7168   ;;  %vm280_vm4 = vcmask 121856  }
  0x39   : > { %s858_s29 = smov 127   ;;  %s859_s26 = smov 112   ;;  %752 = vset.pattern.permute.xlu1 %v863_v6  ;;  %753 = vset.pattern.permute.xlu0 %v863_v6  ;;  %v246_v8 = vand.u32 127, %v245_v7  ;;  %vm272_vm5 = vcmask 130048   ;;  %vm302_vm7 = vcmask 1039360   ;;  %vm362_vm8 = vcmask 1043456  }
  0x3a   : > { %v727_v2 = vpack.i.bf16 %v1014_v1, %v1010_v0  ;;  %v737_v3 = vpack.i.bf16 %v1010_v0, %v1014_v1  ;;  %s860_s28 = smov 113   ;;  %s861_s8 = smov 111   ;;  %vm324_vm9 = vcmask 916480   ;;  %vm313_vm11 = vcmask 924672   ;;  %v244_v20 = vld [vmem:[%s1156_s4] sm:$0xf] }
  0x3b   : > { %v247_v9 = vadd.s32 128, %v246_v8  ;;  %v248_v10 = vand.u32 15, %v246_v8  ;;  %vm332_vm12 = vcmask 908288   ;;  %vm376_vm13 = vcmask 293888   ;;  %s549_s7 = scalar_lea.sflag [#allocation4], %s1000_s13  ;;  %p1174_p11 = scmp.ne.s32.totalorder %s1161_s30, 0 }
  0x3c   : > { %728 = vrot.lane.b32.xlu1 %v727_v2, %s854_s12  ;;  %718 = vrot.lane.b32.xlu0 %v727_v2, %s855_s14  ;;  %vm464_vm14 = vcmask 64512  }
  0x3d   : > { %v249_v11 = vand.u32 15, %v247_v9  ;;  %vm1025_vm1 = vcmp.ne.s32.totalorder %v248_v10, 0  ;;  %vm1042_vm10 = vcmp.ne.s32.totalorder %v248_v10, 15 }
  0x3f   : > { %vm1029_vm3 = vcmp.ne.s32.totalorder %v249_v11, 0  ;;  %vm1033_vm6 = vcmp.ne.s32.totalorder %v249_v11, 15 }
  0x40   : > { %733 = vrot.lane.b32.xlu1 %v727_v2, %s856_s16  ;;  %723 = vrot.lane.b32.xlu0 %v727_v2, %s857_s25  ;;  %s652_s16 = sshll.u32 %s916_s22, 7  ;;  %s240_s25 = scalar_lea.vmem [#allocation5], %s640_s17 }
  0x41   : > { %s864_s22 = smov [#allocation5]  }
  0x42   : > { %s789_s17 = sshll.u32 %s864_s22, 4  ;;  %s790_s17 = int_to_ptr.vmem [resolvable:$false] %s789_s17 }
  0x43   : > { %s791_s10 = scalar_lea.vmem %s790_s17, 256 }
  0x44   : > { %738 = vrot.lane.b32.xlu0 %v737_v3, %s858_s29  ;;  %743 = vrot.lane.b32.xlu1 %v737_v3, %s859_s26  ;;  %s563_s29 = sshll.u32 %s240_s25, 4  ;;  %s1110_s29 = int_to_ptr.vmem [resolvable:$true] %s563_s29 }
  0x45   : > { %s785_s9 = scalar_lea.vmem %s1110_s29, 128  ;;  %p792_p7 = scmp.lt.s32.totalorder %s1110_s29, %s790_s17 }
  0x46   : > { %p786_p6 = scmp.ne.s32.totalorder %s1110_s29, %s785_s9  ;;  %p793_p10 = scmp.lt.s32.totalorder %s791_s10, %s785_s9 }
  0x48   : > { %748 = vrot.lane.b32.xlu0 %v737_v3, %s860_s28  ;;  %330 = vrot.lane.b32.xlu1 %v1014_v1, %s861_s8  ;;  %p787_p12 = pnand %p786_p6, %p1174_p11  ;;  %p794_p2 = por %p793_p10, %p792_p7 }
  0x4a   : > { %p788_p13 = pneg %p787_p12 }
  0x4c   : > { %328 = vrot.lane.b32.xlu0 %v1010_v0, %s861_s8  ;;  %373 = vperm.xlu1 %752, %v243_v5   ;;  %s1108_s8 = scalar_lea.hbm %s1157_s5, %s652_s16  ;;  %p795_p4 = pnand %p794_p2, %p788_p13 }
  0x50   : > { %461 = vperm.xlu0 %753, %v244_v20  }
  0xae   : > { %v729_v12 = vpop.permute.xlu1 %728  ;;  %v719_v14 = vpop.permute.xlu0 %718 }
  0xaf   : > { %v731_v16 = vunpack.i.h.bf16 %v729_v12  ;;  %v730_v17 = vunpack.i.l.bf16 %v729_v12  ;;  %v721_v18 = vunpack.i.h.bf16 %v719_v14  ;;  %v720_v19 = vunpack.i.l.bf16 %v719_v14 }
  0xb1   : > { %v292_v21 = vsel %vm291_vm2, %v720_v19, %v721_v18  ;;  %v295_v22 = vsel %vm291_vm2, 0.0, %v720_v19  ;;  %v262_v23 = vsel %vm261_vm0, %v730_v17, %v731_v16  ;;  %v265_v32 = vsel %vm261_vm0, 0.0, %v730_v17 }
  0xb2   : > { %v296_v24 = vsel %vm1025_vm1, %v295_v22, 0.0  ;;  %v734_v25 = vpop.permute.xlu1 %733  ;;  %v724_v26 = vpop.permute.xlu0 %723  ;;  %v297_v27 = vsel %vm1029_vm3, %v292_v21, 0.0  ;;  %v267_v34 = vsel %vm1029_vm3, %v262_v23, 0.0  ;;  %v266_v52 = vsel %vm1025_vm1, %v265_v32, 0.0 }
  0xb3   : > { %v736_v29 = vunpack.i.h.bf16 %v734_v25  ;;  %v735_v30 = vunpack.i.l.bf16 %v734_v25  ;;  %v726_v31 = vunpack.i.h.bf16 %v724_v26  ;;  %v725_v33 = vunpack.i.l.bf16 %v724_v26  ;;  %v241_v26 = vld [vmem:[%s1153_s1] sm:$0xff] }
  0xb4   : > { %v346_v35 = vrot.slane %v296_v24, 4  ;;  %v347_v38 = vrot.slane %v297_v27, 4 }
  0xb5   : > { %v284_v36 = vsel %vm280_vm4, 0.0, %v735_v30  ;;  %v281_v37 = vsel %vm280_vm4, %v735_v30, %v736_v29  ;;  %v275_v39 = vsel %vm272_vm5, 0.0, %v725_v33  ;;  %v273_v42 = vsel %vm272_vm5, %v725_v33, %v726_v31 }
  0xb6   : > { %v739_v40 = vpop.permute.xlu0 %738  ;;  %v744_v41 = vpop.permute.xlu1 %743  ;;  %v286_v43 = vsel %vm1033_vm6, %v281_v37, 0.0  ;;  %v285_v44 = vsel %vm1042_vm10, %v284_v36, 0.0  ;;  %v340_v45 = vrot.slane %v275_v39, 4  ;;  %v341_v50 = vrot.slane %v273_v42, 4 }
  0xb7   : > { %v741_v46 = vunpack.i.h.bf16 %v739_v40  ;;  %v740_v47 = vunpack.i.l.bf16 %v739_v40  ;;  %v746_v48 = vunpack.i.h.bf16 %v744_v41  ;;  %v745_v49 = vunpack.i.l.bf16 %v744_v41 }
  0xb8   : > { %v366_v51 = vsel %vm362_vm8, %v286_v43, %v347_v38  ;;  %v363_v55 = vsel %vm362_vm8, %v266_v52, %v340_v45  ;;  %v365_v56 = vsel %vm362_vm8, %v285_v44, %v346_v35  ;;  %v364_v61 = vsel %vm362_vm8, %v267_v34, %v341_v50  ;;  %v242_v34 = vld [vmem:[%s1155_s3] sm:$0xf] }
  0xb9   : > { %v303_v53 = vsel %vm302_vm7, %v741_v46, %v740_v47  ;;  %v306_v54 = vsel %vm302_vm7, %v740_v47, 0.0  ;;  %v325_v58 = vsel %vm324_vm9, %v746_v48, %v745_v49  ;;  %v327_v59 = vsel %vm324_vm9, %v745_v49, 0.0 }
  0xba   : > { %v308_v57 = vsel %vm1033_vm6, %v306_v54, 0.0  ;;  %v749_v60 = vpop.permute.xlu0 %748  ;;  %v358_v63 = vrot.slane %v325_v58, 4  ;;  %v359_v2 = vrot.slane %v327_v59, 4  ;;  %v653_v5 = vpack.c.bf16 %v366_v51, %v364_v61  ;;  %v331_v8 = vpop.permute.xlu1 %330 }
  0xbb   : > { %v354_v62 = vrot.slane %v308_v57, 4  ;;  %v751_v3 = vunpack.i.h.bf16 %v749_v60  ;;  %v750_v4 = vunpack.i.l.bf16 %v749_v60  ;;  %v307_v6 = vsel %vm1042_vm10, %v303_v53, 0.0 }
  0xbc   : > { %v655_v7 = vpack.c.bf16 %v365_v56, %v363_v55  ;;  %v353_v9 = vrot.slane %v307_v6, 4  ;;  %654 = vmatprep.subr.bf16.mxu0 %v653_v5  ;;  %v336_v14 = vsel %vm332_vm12, %v331_v8, 0.0 }
  0xbd   : > { %v314_v10 = vsel %vm313_vm11, %v751_v3, %v750_v4  ;;  %v317_v11 = vsel %vm313_vm11, %v750_v4, 0.0  ;;  %v368_v18 = vsel %vm362_vm8, %v1014_v1, %v354_v62  ;;  %v338_v24 = vsel %vm1033_vm6, %v336_v14, 0.0 }
  0xbe   : > { %v319_v12 = vsel %vm1029_vm3, %v317_v11, 0.0  ;;  %656 = vmatpush1.bf16.msra.mxu0 %v655_v7  ;;  %v329_v16 = vpop.permute.xlu0 %328  ;;  %v318_v17 = vsel %vm1025_vm1, %v314_v10, 0.0  ;;  %v367_v21 = vsel %vm362_vm8, %v1010_v0, %v353_v9 }
  0xbf   : > { %v370_v19 = vsel %vm362_vm8, %v319_v12, %v359_v2  ;;  %v369_v22 = vsel %vm362_vm8, %v318_v17, %v358_v63  ;;  %v333_v25 = vsel %vm332_vm12, %v329_v16, %v331_v8 }
  0xc0   : > { %v657_v23 = vpack.c.bf16 %v370_v19, %v368_v18  ;;  %v659_v15 = vpack.c.bf16 %v369_v22, %v367_v21  ;;  %v337_v13 = vsel %vm1042_vm10, %v333_v25, 0.0 }
  0xc2   : > { %658 = vmatprep.subr.bf16.mxu0 %v657_v23 }
  0xc3   : > { %660 = vmatpush1.bf16.msra.mxu0 %v659_v15 }
  0xc4   : > { %642 = vmatprep.subr.msk.mxu0 %vm362_vm8, %v338_v24 }
  0xc7   : > { %643 = vmatpush1.msk.msra.mxu0 %vm362_vm8, %v337_v13 }
  0xc8   : > { %644 = vmatmul.mubr.msk.f32.vlgmr.msra.gmra.mrb[0].mxu0 %vm376_vm13, %v241_v26 }
  0xcb   : > { %v374_v27 = vpop.permute.xlu1 %373 }
  0xcf   : > { %v462_v35 = vpop.permute.xlu0 %461 }
 0x19b   : > { %v452_v29 = vpop.f32.mrb[0].mxu0 }
 0x19c   : > { %v453_v30 = vadd.f32 %v452_v29, %v374_v27  ;;  %v454_v28 = vpop.f32.mrb[1].mxu0 }
 0x19d   : > { %v455_v31 = vadd.f32 %v454_v28, %v374_v27 }
 0x19e   : > { %v457_v33 = vmax.f32 %v453_v30, 0.0 }
 0x19f   : > { %v458_v32 = vmax.f32 %v455_v31, 0.0 }
 0x1a1   : > { %468 = vmatprep.subr.mxu1 %v458_v32 }
 0x1a2   : > { %469 = vmatpush1.msra.mxu1 %v457_v33 }
 0x1a3   : > { %645 = vmatmul.mubr.msk.f32.vlgmr.msra.gmra.mrb[0].mxu1 %vm464_vm14, %v242_v34 }
 0x276   : > { %v534_v36 = vpop.f32.mrb[0].mxu1 }
 0x277   : > { %v535_v37 = vadd.f32 %v534_v36, %v462_v35  ;;  %v536_v38 = vpop.f32.mrb[1].mxu1 }
 0x278   : > { %v537_v39 = vadd.f32 %v536_v38, %v462_v35 }
 0x279   : > { %v539_v40 = vadd.f32 %v535_v37, %v1010_v0 }
 0x27a   : > { %v540_v41 = vadd.f32 %v537_v39, %v1014_v1 }
 0x27b   : > { %v541_v42 = vmax.f32 %v539_v40, 0.0 }
 0x27c   : > { %v542_v43 = vmax.f32 %v540_v41, 0.0 }
 0x27e   : > { %v545_v44 = vcombine.low %v541_v42, %v542_v43 }
 0x280   : > { %547 = vst [vmem:[%s240_s25] sm:$0xff] %v545_v44 }
 0x281   : > { %798 = shalt.err (!%p795_p4)
}
 0x282   : > { %s799_s13 = scalar_lea.hbm %s1108_s8, 128  ;;  %s803_s15 = scalar_lea.hbm %s1157_s5, 256 }
 0x283   : > { %p800_p5 = scmp.ne.s32.totalorder %s1108_s8, %s799_s13  ;;  %p804_p0 = scmp.lt.u32.totalorder %s1108_s8, %s1157_s5 }
 0x284   : > { %p805_p1 = scmp.lt.u32.totalorder %s803_s15, %s799_s13  ;;  %p807_p6 = scmp.lt.u32.totalorder %s799_s13, %s1108_s8 }
 0x285   : > { %p801_p8 = pnand %p800_p5, %p1174_p11 }
 0x286   : > { %p806_p3 = por %p805_p1, %p804_p0 }
 0x287   : > { %p802_p9 = pneg %p801_p8 }
 0x288   : > { %p808_p12 = por %p807_p6, %p806_p3 }
 0x28a   : > { %p809_p13 = pnand %p808_p12, %p802_p9 }
 0x28c   : > { %812 = shalt.err (!%p809_p13)
}
 0x28d   : > { %663 = dma.vmem_to_hbm [thread:$0]  (%p1174_p11), %s1110_s29, 128, %s1108_s8, %s549_s7  }
 0x28e PF: > { %s575_s16 = sand.u32 1, %s839_s18   ;;  %p1175_p7 = scmp.ne.s32.totalorder %s1162_s6, 0 }
 0x28f   : > { %p1176_p10 = scmp.ge.s32.totalorder %s851_s21, 2  ;;  %s576_s25 = scalar_lea.sflag [#allocation4], %s575_s16 }
 0x291   : > { %p670_p2 = pnand %p1176_p10, %p1175_p7 }
 0x293   : > { %834 = dma.done.wait (!%p670_p2), %s576_s25, 128  }
 0x294   : > { %836 = vsyncadd (!%p670_p2), %s576_s25, 4294967168  ;;  %p18_p4 = scmp.ge.s32.totalorder %s920_s24, 4   ;;  %s1177_s18 = smov %s843_s19 }
 0x295   : > { %s1178_s19 = smov %s847_s20  ;;  %s1179_s20 = smov %s932_s27 }
 0x296   : > { %s1180_s21 = smov %s920_s24  ;;  %20 = sbr.rel (!%p18_p4) target bundleno = 5 (0x5), region = 85 }
 0x29d   :  { %581 = vsyncpa [#allocation3], 1 }
 0x29e   :  { %583 = vsyncpa [#allocation3 + $0x1], 1 }
 0x29f   :  { %584 = vsyncpa [#allocation4], 1 }
 0x2a0   :  { %586 = vsyncpa [#allocation4 + $0x1], 1 }

</bundles_post_ra>
